<compile_context>
chip_gen: v7x
topology: tpu7x:2x2x1
jax: 0.10.0
libtpu: 0.0.40
codegen_flags: <defaults>
</compile_context>

<pallas_src>
import functools

import jax
import jax.numpy as jnp
from jax.experimental import pallas as pl
from jax.experimental.pallas import tpu as pltpu


def _round_up(x, m):
    return ((x + m - 1) // m) * m


def _cross_tile(x_ref, w_ref, precision):
    """MXU cross term x @ w for this (i, j, k) tile, f32 accumulation."""
    return jnp.dot(
        x_ref[...],
        w_ref[...],
        preferred_element_type=jnp.float32,
        precision=precision,
    )


def _finalize(cross, xsq, wsq, g):
    """out = -gamma * max(||x||^2 - 2 x.w + ||w||^2, 0)."""
    sqd = jnp.maximum(xsq.astype(jnp.float32) + wsq.astype(jnp.float32) - 2.0 * cross, 0.0)
    return -g.astype(jnp.float32) * sqd


def _gauss_kernel_single(x_ref, xsq_ref, w_ref, wsq_ref, g_ref, o_ref, *, precision):
    # K fits in one block: no accumulator, no init/finalize phases.
    cross = _cross_tile(x_ref, w_ref, precision)
    o_ref[...] = _finalize(cross, xsq_ref[...], wsq_ref[...], g_ref[...]).astype(o_ref.dtype)


def _gauss_kernel_multi_inplace(x_ref, xsq_ref, w_ref, wsq_ref, g_ref, o_ref, *, precision):
    # f32 output: its block index is constant across k, so the o_ref tile is
    # VMEM-resident across the K loop -- accumulate the cross term in place.
    k = pl.program_id(2)
    cross = _cross_tile(x_ref, w_ref, precision)

    @pl.when(k == 0)
    def _():
        o_ref[...] = cross  # first K-tile: plain write, no zero-fill

    @pl.when(k > 0)
    def _():
        o_ref[...] += cross

    @pl.when(k == pl.num_programs(2) - 1)
    def _():
        o_ref[...] = _finalize(o_ref[...], xsq_ref[...], wsq_ref[...], g_ref[...])


def _gauss_kernel_multi_scratch(x_ref, xsq_ref, w_ref, wsq_ref, g_ref, o_ref, acc_ref, *, precision):
    # Sub-f32 output dtype: keep an f32 VMEM accumulator, cast once at the end.
    k = pl.program_id(2)
    cross = _cross_tile(x_ref, w_ref, precision)

    @pl.when(k == 0)
    def _():
        acc_ref[...] = cross

    @pl.when(k > 0)
    def _():
        acc_ref[...] += cross

    @pl.when(k == pl.num_programs(2) - 1)
    def _():
        o_ref[...] = _finalize(acc_ref[...], xsq_ref[...], wsq_ref[...], g_ref[...]).astype(o_ref.dtype)


def gauss_forward(D, w_t, gamma, *, tm=None, tn=None, tk=None,
                  matmul_precision=jax.lax.Precision.HIGHEST):
    """Gauss forward.

    D:     (M, K)  activations.
    w_t:   (K, N)  weight, pre-transposed from PyTorch's (N, K). Cache this
                   transpose (and ideally w_sq / gamma below) outside the
                   per-step jit; they are static parameters.
    gamma: (N,)    per-output scale.
    Returns (M, N) = -gamma * sum_k (D[:, k, None] - w_t[None, k, :])**2.
    """
    M, K = D.shape
    K2, N = w_t.shape
    assert K == K2
    assert gamma.shape == (N,)

    # Sublane alignment: 8 for 32-bit dtypes, 16 for sub-32-bit (bf16) operands.
    m_align = 8 if jnp.dtype(D.dtype).itemsize >= 4 else 16

    # MXU / lane-aligned tiles. Double-buffered f32 footprint at the caps:
    # 2*(tm*tk + tk*tn + tm*tn)*4B ~= 10-11 MiB -> fits every generation's
    # scoped VMEM (v5e 16 MiB default, v6e 32 MiB, v7x 64 MiB physical).
    tm = tm or min(_round_up(M, m_align), 512)
    tn = tn or min(_round_up(N, 128), 512)     # lane-dense output (multiple of 128)
    tk = tk or min(_round_up(K, 128), 1024)

    # v7x has 2 TensorCores: if M fits one i-block, split N into >=2 j-blocks
    # (when it divides cleanly) so the "parallel" axis feeds both cores.
    if (M + tm - 1) // tm == 1:
        np_full = _round_up(N, 128)
        if np_full % 256 == 0 and np_full <= tn:
            tn = np_full // 2

    Mp, Np, Kp = _round_up(M, tm), _round_up(N, tn), _round_up(K, tk)

    # Hoisted norms: one XLA pass each, added only in the finalize phase.
    x_sq = jnp.sum(D.astype(jnp.float32) ** 2, axis=1, keepdims=True)    # (M, 1)
    w_sq = jnp.sum(w_t.astype(jnp.float32) ** 2, axis=0, keepdims=True)  # (1, N)

    def pad2(a, rows, cols):
        # Skip the extra HBM read+write entirely when already tile-aligned.
        if rows == 0 and cols == 0:
            return a
        return jnp.pad(a, ((0, rows), (0, cols)))

    Dp = pad2(D, Mp - M, Kp - K)            # zero K-padding adds (0-0)^2 = 0
    Wp = pad2(w_t, Kp - K, Np - N)
    Xsqp = pad2(x_sq, Mp - M, 0)
    Wsqp = pad2(w_sq, 0, Np - N)
    Gp = pad2(gamma.reshape(1, N).astype(jnp.float32), 0, Np - N)

    grid = (Mp // tm, Np // tn, Kp // tk)
    single_k = grid[2] == 1
    out_dtype = D.dtype
    f32_out = jnp.dtype(out_dtype) == jnp.dtype(jnp.float32)

    if single_k:
        kernel = _gauss_kernel_single
        scratch = []
    elif f32_out:
        kernel = _gauss_kernel_multi_inplace     # accumulate directly in o_ref
        scratch = []
    else:
        kernel = _gauss_kernel_multi_scratch
        scratch = [pltpu.VMEM((tm, tn), jnp.float32)]

    out = pl.pallas_call(
        functools.partial(kernel, precision=matmul_precision),
        out_shape=jax.ShapeDtypeStruct((Mp, Np), out_dtype),
        grid_spec=pltpu.PrefetchScalarGridSpec(
            num_scalar_prefetch=0,
            grid=grid,
            in_specs=[
                pl.BlockSpec((tm, tk), lambda i, j, k: (i, k)),   # D tile
                pl.BlockSpec((tm, 1), lambda i, j, k: (i, 0)),    # ||x||^2 (resident per i)
                pl.BlockSpec((tk, tn), lambda i, j, k: (k, j)),   # W^T tile
                pl.BlockSpec((1, tn), lambda i, j, k: (0, j)),    # ||w||^2 (resident per j)
                pl.BlockSpec((1, tn), lambda i, j, k: (0, j)),    # gamma    (resident per j)
            ],
            out_specs=pl.BlockSpec((tm, tn), lambda i, j, k: (i, j)),
            scratch_shapes=scratch,
        ),
        compiler_params=pltpu.CompilerParams(
            dimension_semantics=("parallel", "parallel", "arbitrary"),
            vmem_limit_bytes=32 * 1024 * 1024,   # safe on v5e/v6e/v7x, gives headroom
        ),
    )(Dp, Xsqp, Wp, Wsqp, Gp)

    if Mp == M and Np == N:
        return out
    return out[:M, :N]


def make_gauss_params(key, in_features, out_features, gamma_value, dtype=jnp.float32):
    """Deterministic init mimicking the PyTorch module:
    weight ~ U(5/gamma^2, 50/gamma^2) with shape (out, in); gamma = gamma_value * ones.
    Returns the weight already transposed to (in_features, out_features).
    """
    low = 5.0 / gamma_value**2
    high = 50.0 / gamma_value**2
    w = jax.random.uniform(
        key, (out_features, in_features), dtype=dtype, minval=low, maxval=high
    )
    gamma = jnp.full((out_features,), gamma_value, dtype=dtype)
    return w.T, gamma  # (in_features, out_features), (out_features,)


def _reference(D, w_t, gamma):
    diff = D[:, :, None] - w_t[None, :, :]
    return -gamma[None, :] * jnp.sum(diff * diff, axis=1)


if __name__ == "__main__":
    gamma_value = 2.0
    key = jax.random.PRNGKey(0)
    kx, kw, kx2, kw2 = jax.random.split(key, 4)

    # --- Small module-sized test (single-K path) ------------------------------
    batch, in_features, out_features = 8, 32, 64
    D = jax.random.normal(kx, (batch, in_features), dtype=jnp.float32)
    w_t, gamma = make_gauss_params(kw, in_features, out_features, gamma_value)

    out = jax.block_until_ready(gauss_forward(D, w_t, gamma))
    ref = _reference(D, w_t, gamma)
    assert out.shape == (batch, out_features)
    assert jnp.allclose(out, ref, rtol=1e-3, atol=1e-2), float(jnp.max(jnp.abs(out - ref)))

    # --- Multi-K / padding path (forced small tiles) ---------------------------
    M2, K2, N2 = 16, 200, 130  # K, N not tile multiples -> exercises zero-padding
    D2 = jax.random.normal(kx2, (M2, K2), dtype=jnp.float32)
    w2_t, gamma2 = make_gauss_params(kw2, K2, N2, gamma_value)

    out2 = jax.block_until_ready(gauss_forward(D2, w2_t, gamma2, tm=8, tn=128, tk=128))
    ref2 = _reference(D2, w2_t, gamma2)
    assert out2.shape == (M2, N2)
    assert jnp.allclose(out2, ref2, rtol=1e-3, atol=1e-2), float(jnp.max(jnp.abs(out2 - ref2)))

    print("KERNEL_OK")
</pallas_src>

<mosaic_0001>
module attributes {stable_mosaic.version = 11 : i64} {
  func.func @_gauss_kernel_single(%arg0: i32, %arg1: i32, %arg2: i32, %arg3: memref<8x128xf32, #tpu.memory_space<vmem>>, %arg4: memref<8x1xf32, #tpu.memory_space<vmem>>, %arg5: memref<128x128xf32, #tpu.memory_space<vmem>>, %arg6: memref<1x128xf32, #tpu.memory_space<vmem>>, %arg7: memref<1x128xf32, #tpu.memory_space<vmem>>, %arg8: memref<8x128xf32, #tpu.memory_space<vmem>>) attributes {dimension_semantics = [#tpu.dimension_semantics<parallel>, #tpu.dimension_semantics<parallel>, #tpu.dimension_semantics<arbitrary>], iteration_bounds = array<i64: 1, 1, 1>, scalar_prefetch = 0 : i64, scratch_operands = 0 : i64, tpu.core_type = #tpu.core_type<tc>, window_params = [{transform_indices = @transform_0, window_bounds = array<i64: 8, 128>}, {transform_indices = @transform_1, window_bounds = array<i64: 8, 1>}, {transform_indices = @transform_2, window_bounds = array<i64: 128, 128>}, {transform_indices = @transform_3, window_bounds = array<i64: 1, 128>}, {transform_indices = @transform_4, window_bounds = array<i64: 1, 128>}, {transform_indices = @transform_5, window_bounds = array<i64: 8, 128>}]} {
    %c0 = arith.constant 0 : index
    %c0_0 = arith.constant 0 : index
    %0 = vector.load %arg3[%c0, %c0_0] : memref<8x128xf32, #tpu.memory_space<vmem>>, vector<8x128xf32>
    %c0_1 = arith.constant 0 : index
    %c0_2 = arith.constant 0 : index
    %1 = vector.load %arg5[%c0_1, %c0_2] : memref<128x128xf32, #tpu.memory_space<vmem>>, vector<128x128xf32>
    %cst = arith.constant dense<0.000000e+00> : vector<8x128xf32>
    %2 = tpu.matmul %0, %1, %cst {dimension_numbers = #tpu.dot_dimension_numbers<[1], [0], [0], [1], [0, 0, 1, 1], [], []>, precision = #tpu.contract_precision<fp32>} : vector<8x128xf32>, vector<128x128xf32>, vector<8x128xf32> -> vector<8x128xf32>
    %c0_3 = arith.constant 0 : index
    %c0_4 = arith.constant 0 : index
    %3 = vector.load %arg4[%c0_3, %c0_4] : memref<8x1xf32, #tpu.memory_space<vmem>>, vector<8x1xf32>
    %c0_5 = arith.constant 0 : index
    %c0_6 = arith.constant 0 : index
    %4 = vector.load %arg6[%c0_5, %c0_6] : memref<1x128xf32, #tpu.memory_space<vmem>>, vector<1x128xf32>
    %c0_7 = arith.constant 0 : index
    %c0_8 = arith.constant 0 : index
    %5 = vector.load %arg7[%c0_7, %c0_8] : memref<1x128xf32, #tpu.memory_space<vmem>>, vector<1x128xf32>
    %6 = vector.broadcast %3 : vector<8x1xf32> to vector<8x128xf32>
    %7 = vector.broadcast %4 : vector<1x128xf32> to vector<8x128xf32>
    %8 = arith.addf %6, %7 : vector<8x128xf32>
    %cst_9 = arith.constant 2.000000e+00 : f32
    %9 = vector.broadcast %cst_9 : f32 to vector<8x128xf32>
    %10 = arith.mulf %9, %2 : vector<8x128xf32>
    %11 = arith.subf %8, %10 : vector<8x128xf32>
    %cst_10 = arith.constant 0.000000e+00 : f32
    %12 = vector.broadcast %cst_10 : f32 to vector<8x128xf32>
    %13 = arith.maximumf %11, %12 : vector<8x128xf32>
    %cst_11 = arith.constant 0.000000e+00 : f32
    %14 = vector.broadcast %cst_11 : f32 to vector<1x128xf32>
    %15 = arith.subf %14, %5 : vector<1x128xf32>
    %16 = vector.broadcast %15 : vector<1x128xf32> to vector<8x128xf32>
    %17 = arith.mulf %16, %13 : vector<8x128xf32>
    %c0_12 = arith.constant 0 : index
    %c0_13 = arith.constant 0 : index
    %18 = vector.load %arg8[%c0_12, %c0_13] : memref<8x128xf32, #tpu.memory_space<vmem>>, vector<8x128xf32>
    tpu.vector_store %arg8[%c0_12, %c0_13], %17 {strides = array<i32>} : memref<8x128xf32, #tpu.memory_space<vmem>>, vector<8x128xf32>,
    return
  }
  func.func @transform_0(%arg0: i32, %arg1: i32, %arg2: i32) -> (i32, i32) {
    %c0_i32 = arith.constant 0 : i32
    return %arg0, %arg2 : i32, i32
  }
  func.func @transform_1(%arg0: i32, %arg1: i32, %arg2: i32) -> (i32, i32) {
    %c0_i32 = arith.constant 0 : i32
    %c0_i32_0 = arith.constant 0 : i32
    return %arg0, %c0_i32 : i32, i32
  }
  func.func @transform_2(%arg0: i32, %arg1: i32, %arg2: i32) -> (i32, i32) {
    %c0_i32 = arith.constant 0 : i32
    return %arg2, %arg1 : i32, i32
  }
  func.func @transform_3(%arg0: i32, %arg1: i32, %arg2: i32) -> (i32, i32) {
    %c0_i32 = arith.constant 0 : i32
    %c0_i32_0 = arith.constant 0 : i32
    return %c0_i32, %arg1 : i32, i32
  }
  func.func @transform_4(%arg0: i32, %arg1: i32, %arg2: i32) -> (i32, i32) {
    %c0_i32 = arith.constant 0 : i32
    %c0_i32_0 = arith.constant 0 : i32
    return %c0_i32, %arg1 : i32, i32
  }
  func.func @transform_5(%arg0: i32, %arg1: i32, %arg2: i32) -> (i32, i32) {
    %c0_i32 = arith.constant 0 : i32
    return %arg0, %arg1 : i32, i32
  }
}

</mosaic_0001>

<bundles_post_ra>
// kernel: tpu_custom_call.1
= control target key start
LH: loop header
LB: loop body
LE: loop exit
PB: predicated region body
PF: predicated region fallthrough
CT: control target
= control target key end

     0   :  { %10 = vsyncpa [#allocation3], 0  ;;  %s1579_s0 = inlined_call_operand.vmem [shape: f32[8,128], index: 0, kind: input, shape index: {}]   ;;  %s1580_s1 = inlined_call_operand.vmem [shape: f32[8,1], index: 1, kind: input, shape index: {}]   ;;  %s1581_s2 = inlined_call_operand.hbm [shape: f32[128,128], index: 2, kind: input, shape index: {}]   ;;  %s1582_s3 = inlined_call_operand.vmem [shape: f32[1,128], index: 3, kind: input, shape index: {}]   ;;  %s1583_s4 = inlined_call_operand.vmem [shape: f32[1,128], index: 4, kind: input, shape index: {}]   ;;  %s1584_s5 = inlined_call_operand.hbm [shape: f32[8,128], index: 5, kind: output, shape index: {}]  }
   0x1   :  { %11 = vsyncpa [#allocation4], 0  ;;  %s1258_s18 = smov [#allocation2]   ;;  %s1210_s22 = scalar_lea.hbm %s1581_s2, 2048 }
   0x2   :  { %s21_s19 = sshll.u32 %s1258_s18, 4  ;;  %p1211_p0 = scmp.ne.s32.totalorder %s1581_s2, %s1210_s22  ;;  %s22_s19 = int_to_ptr.vmem [resolvable:$true] %s21_s19 }
   0x3   :  { %p1214_p1 = scmp.lt.u32.totalorder %s1210_s22, %s1581_s2 }
   0x5   :  { %p1216_p2 = pnand %p1214_p1, %p1211_p0 }
   0x7   :  { %1219 = shalt.err (!%p1216_p2)
}
   0x8   :  { %s1220_s27 = scalar_lea.vmem %s22_s19, 2048  ;;  %p1225_p4 = scmp.lt.s32.totalorder %s22_s19, %s22_s19 }
   0x9   :  { %p1221_p3 = scmp.ne.s32.totalorder %s22_s19, %s1220_s27  ;;  %p1226_p5 = scmp.lt.s32.totalorder %s1220_s27, %s1220_s27 }
   0xb   :  { %p1227_p6 = por %p1226_p5, %p1225_p4 }
   0xd   :  { %p1228_p7 = pnand %p1227_p6, %p1221_p3 }
   0xf   :  { %1231 = shalt.err (!%p1228_p7)
}
  0x10   :  { %s1259_s28 = smov 128   ;;  %s1260_s29 = smov 8  }
  0x11   :  { %27 = dma.hbm_to_vmem [thread:$0]  %s1581_s2, 2048, %s22_s19, [#allocation3], %s1259_s28, %s1259_s28, %s1260_s29  }
  0x12   :  { %1254 = dma.done.wait [#allocation3], 2048  }
  0x13   :  { %1255 = vsyncadd [#allocation3], 4294965248  ;;  %v1261_v0 = vmov 0.0|0.0   ;;  %vm1262_vm0 = vmmov 0   ;;  %v1263_v1 = vmov 0.0   ;;  %v1264_v2 = vmov 0  }
  0x14   :  { %1048 = vmatprep.subr.bf16.mxu1 %v1261_v0  ;;  %1120 = vmatprep.subr.bf16.mxu0 %v1261_v0  ;;  %v36_v3 = vld [vmem:[#allocation2] sm:$0xff]  ;;  %v37_v4 = vld [vmem:[#allocation2 + $0x8] sm:$0xff]  ;;  %v38_v5 = vld [vmem:[#allocation2 + $0x10] sm:$0xff]  ;;  %s1265_s12 = smov [#allocation5]  }
  0x15   :  { %870 = vmatprep.mubr.msk.f32.mxu1 %vm1262_vm0, %v1263_v1  ;;  %975 = vmatprep.mubr.msk.f32.mxu0 %vm1262_vm0, %v1263_v1  ;;  %v53_v6 = vand.u32 4294901760, %v36_v3  ;;  %v56_v7 = vand.u32 4294901760, %v37_v4  ;;  %v39_v8 = vld [vmem:[#allocation2 + $0x18] sm:$0xff]  ;;  %v59_v9 = vand.u32 4294901760, %v38_v5  ;;  %v40_v11 = vld [vmem:[#allocation2 + $0x20] sm:$0xff]  ;;  %v41_v12 = vld [vmem:[#allocation2 + $0x28] sm:$0xff] }
  0x16   :  { %1209 = vset.pattern.permute.xlu0 %v1264_v2  ;;  %v62_v10 = vand.u32 4294901760, %v39_v8  ;;  %v65_v15 = vand.u32 4294901760, %v40_v11  ;;  %v68_v16 = vand.u32 4294901760, %v41_v12  ;;  %v693_v17 = vld [vmem:[%s1580_s1] sm:$0xff]  ;;  %v42_v18 = vld [vmem:[#allocation2 + $0x30] sm:$0xff]  ;;  %v43_v19 = vld [vmem:[#allocation2 + $0x38] sm:$0xff] }
  0x17   :  { %v1314_v13 = vpack.c.bf16 %v56_v7, %v53_v6  ;;  %698 = vperm.xlu0 %1209, %v693_v17   ;;  %v71_v21 = vand.u32 4294901760, %v42_v18  ;;  %v74_v22 = vand.u32 4294901760, %v43_v19  ;;  %v1331_v23 = vld [vmem:[#allocation2 + $0x40] sm:$0xff]  ;;  %v1333_v24 = vld [vmem:[#allocation2 + $0x48] sm:$0xff]  ;;  %v1346_v29 = vld [vmem:[#allocation2 + $0x50] sm:$0xff]  ;;  %v1350_v31 = vsub.f32 %v36_v3, %v53_v6  ;;  %s726_s13 = sshll.u32 %s1265_s12, 4  ;;  %s727_s13 = int_to_ptr.vmem [resolvable:$true] %s726_s13 }
  0x18   :  { %v1318_v14 = vpack.c.bf16 %v62_v10, %v59_v9  ;;  %v1327_v20 = vpack.c.bf16 %v68_v16, %v65_v15  ;;  %v77_v26 = vand.u32 4294901760, %v1331_v23  ;;  %v80_v27 = vand.u32 4294901760, %v1333_v24  ;;  %v35_v28 = vld [vmem:[%s1579_s0] sm:$0xff]  ;;  %v1348_v30 = vld [vmem:[#allocation2 + $0x58] sm:$0xff]  ;;  %v1366_v38 = vld [vmem:[#allocation2 + $0x68] sm:$0xff]  ;;  %p1237_p9 = scmp.lt.s32.totalorder %s727_s13, %s727_s13 }
  0x19   :  { %1050 = vmatpush3.bf16.msra.mxu1 %v1314_v13  ;;  %1122 = vmatpush3.bf16.msra.mxu0 %v1314_v13  ;;  %v1337_v25 = vpack.c.bf16 %v74_v22, %v71_v21  ;;  %v1352_v32 = vand.u32 4294901760, %v35_v28  ;;  %v1354_v33 = vsub.f32 %v37_v4, %v56_v7  ;;  %v83_v35 = vand.u32 4294901760, %v1346_v29  ;;  %v1362_v37 = vld [vmem:[#allocation2 + $0x60] sm:$0xff]  ;;  %v1385_v45 = vld [vmem:[#allocation2 + $0x70] sm:$0xff]  ;;  %v1387_v46 = vld [vmem:[#allocation2 + $0x78] sm:$0xff] }
  0x1a   :  { %1051 = vmatprep.subr.bf16.mxu1 %v1261_v0  ;;  %1123 = vmatprep.subr.bf16.mxu0 %v1261_v0  ;;  %v1358_v34 = vpack.c.bf16 %v80_v27, %v77_v26  ;;  %v86_v36 = vand.u32 4294901760, %v1348_v30  ;;  %v1368_v39 = vsub.f32 %v38_v5, %v59_v9  ;;  %v1370_v40 = vsub.f32 %v39_v8, %v62_v10 }
  0x1b   :  { %v89_v41 = vand.u32 4294901760, %v1362_v37  ;;  %v1374_v42 = vsub.f32 %v35_v28, %v1352_v32  ;;  %v92_v44 = vand.u32 4294901760, %v1366_v38  ;;  %v146_v47 = vand.u32 4294901760, %v1350_v31 }
  0x1c   :  { %v1382_v43 = vpack.c.bf16 %v86_v36, %v83_v35  ;;  %v153_v48 = vand.u32 4294901760, %v1354_v33  ;;  %v1393_v49 = vsub.f32 %v40_v11, %v65_v15  ;;  %v1395_v50 = vsub.f32 %v41_v12, %v68_v16 }
  0x1d   :  { %1053 = vmatpush3.bf16.msra.mxu1 %v1318_v14  ;;  %1125 = vmatpush3.bf16.msra.mxu0 %v1318_v14  ;;  %v95_v51 = vand.u32 4294901760, %v1385_v45  ;;  %v98_v52 = vand.u32 4294901760, %v1387_v46  ;;  %v135_v53 = vand.u32 4294901760, %v1374_v42  ;;  %v160_v54 = vand.u32 4294901760, %v1368_v39 }
  0x1e   :  { %1054 = vmatprep.subr.bf16.mxu1 %v1261_v0  ;;  %1126 = vmatprep.subr.bf16.mxu0 %v1261_v0  ;;  %v1407_v55 = vpack.c.bf16 %v92_v44, %v89_v41  ;;  %v147_v56 = vsub.f32 %v1350_v31, %v146_v47  ;;  %v154_v57 = vsub.f32 %v1354_v33, %v153_v48  ;;  %v167_v58 = vand.u32 4294901760, %v1370_v40 }
  0x1f   :  { %v1414_v59 = vsub.f32 %v42_v18, %v71_v21  ;;  %v1416_v60 = vsub.f32 %v43_v19, %v74_v22  ;;  %v136_v61 = vsub.f32 %v1374_v42, %v135_v53  ;;  %v161_v62 = vsub.f32 %v1368_v39, %v160_v54 }
  0x20   :  { %v174_v63 = vand.u32 4294901760, %v1393_v49  ;;  %v181_v2 = vand.u32 4294901760, %v1395_v50  ;;  %v1428_v3 = vpack.c.bf16 %v98_v52, %v95_v51  ;;  %v148_v4 = vand.u32 4294901760, %v147_v56 }
  0x21   :  { %1056 = vmatpush3.bf16.msra.mxu1 %v1327_v20  ;;  %1128 = vmatpush3.bf16.msra.mxu0 %v1327_v20  ;;  %v155_v5 = vand.u32 4294901760, %v154_v57  ;;  %v168_v6 = vsub.f32 %v1370_v40, %v167_v58  ;;  %v1434_v7 = vsub.f32 %v1331_v23, %v77_v26  ;;  %v1437_v8 = vsub.f32 %v1333_v24, %v80_v27 }
  0x22   :  { %1057 = vmatprep.subr.bf16.mxu1 %v1261_v0  ;;  %1129 = vmatprep.subr.bf16.mxu0 %v1261_v0  ;;  %v1145_v9 = vpack.c.bf16 %v153_v48, %v146_v47  ;;  %v137_v10 = vand.u32 4294901760, %v136_v61  ;;  %v162_v11 = vand.u32 4294901760, %v161_v62  ;;  %v175_v12 = vsub.f32 %v1393_v49, %v174_v63 }
  0x23   :  { %v182_v15 = vsub.f32 %v1395_v50, %v181_v2  ;;  %v1073_v16 = vpack.c.bf16 %v155_v5, %v148_v4  ;;  %v169_v17 = vand.u32 4294901760, %v168_v6  ;;  %v188_v18 = vand.u32 4294901760, %v1414_v59 }
  0x24   :  { %v195_v19 = vand.u32 4294901760, %v1416_v60  ;;  %v1450_v21 = vsub.f32 %v1346_v29, %v83_v35  ;;  %v1455_v22 = vsub.f32 %v1348_v30, %v86_v36  ;;  %v1148_v23 = vpack.c.bf16 %v167_v58, %v160_v54 }
  0x25   :  { %1059 = vmatpush3.bf16.msra.mxu1 %v1337_v25  ;;  %1131 = vmatpush3.bf16.msra.mxu0 %v1337_v25  ;;  %v176_v24 = vand.u32 4294901760, %v175_v12  ;;  %v183_v26 = vand.u32 4294901760, %v182_v15  ;;  %v202_v27 = vand.u32 4294901760, %v1434_v7  ;;  %v1076_v28 = vpack.c.bf16 %v169_v17, %v162_v11 }
  0x26   :  { %1060 = vmatprep.subr.bf16.mxu1 %v1261_v0  ;;  %1132 = vmatprep.subr.bf16.mxu0 %v1261_v0  ;;  %v189_v47 = vsub.f32 %v1414_v59, %v188_v18  ;;  %v196_v29 = vsub.f32 %v1416_v60, %v195_v19  ;;  %v209_v35 = vand.u32 4294901760, %v1437_v8  ;;  %v1466_v30 = vsub.f32 %v1362_v37, %v89_v41 }
  0x27   :  { %v1471_v36 = vsub.f32 %v1366_v38, %v92_v44  ;;  %v1079_v48 = vpack.c.bf16 %v183_v26, %v176_v24  ;;  %v203_v54 = vsub.f32 %v1434_v7, %v202_v27  ;;  %v216_v56 = vand.u32 4294901760, %v1450_v21 }
  0x28   :  { %v190_v37 = vand.u32 4294901760, %v189_v47  ;;  %v197_v41 = vand.u32 4294901760, %v196_v29  ;;  %v210_v57 = vsub.f32 %v1437_v8, %v209_v35  ;;  %v223_v38 = vand.u32 4294901760, %v1455_v22 }
  0x29   :  { %1062 = vmatpush3.bf16.msra.mxu1 %v1358_v34  ;;  %1134 = vmatpush3.bf16.msra.mxu0 %v1358_v34  ;;  %v1486_v44 = vsub.f32 %v1385_v45, %v95_v51  ;;  %v1491_v58 = vsub.f32 %v1387_v46, %v98_v52  ;;  %v1154_v61 = vpack.c.bf16 %v195_v19, %v188_v18  ;;  %v204_v62 = vand.u32 4294901760, %v203_v54 }
  0x2a   :  { %1063 = vmatprep.subr.bf16.mxu1 %v1261_v0  ;;  %1135 = vmatprep.subr.bf16.mxu0 %v1261_v0  ;;  %v1082_v4 = vpack.c.bf16 %v197_v41, %v190_v37  ;;  %v211_v5 = vand.u32 4294901760, %v210_v57  ;;  %v224_v6 = vsub.f32 %v1455_v22, %v223_v38  ;;  %v237_v45 = vand.u32 4294901760, %v1471_v36 }
  0x2b   :  { %v1157_v46 = vpack.c.bf16 %v209_v35, %v202_v27  ;;  %v251_v15 = vand.u32 4294901760, %v1491_v58 }
  0x2c   :  { %v225_v11 = vand.u32 4294901760, %v224_v6  ;;  %v238_v12 = vsub.f32 %v1471_v36, %v237_v45 }
  0x2d   :  { %1065 = vmatpush3.bf16.msra.mxu1 %v1382_v43  ;;  %1137 = vmatpush3.bf16.msra.mxu0 %v1382_v43  ;;  %v252_v24 = vsub.f32 %v1491_v58, %v251_v15 }
  0x2e   :  { %1066 = vmatprep.subr.bf16.mxu1 %v1261_v0  ;;  %1138 = vmatprep.subr.bf16.mxu0 %v1261_v0  ;;  %v239_v19 = vand.u32 4294901760, %v238_v12 }
  0x2f   :  { %v253_v47 = vand.u32 4294901760, %v252_v24 }
  0x31   :  { %1068 = vmatpush3.bf16.msra.mxu1 %v1407_v55  ;;  %1140 = vmatpush3.bf16.msra.mxu0 %v1407_v55 }
  0x32   :  { %1069 = vmatprep.subr.bf16.mxu1 %v1261_v0  ;;  %1141 = vmatprep.subr.bf16.mxu0 %v1261_v0 }
  0x35   :  { %1071 = vmatpush3.bf16.msra.mxu1 %v1428_v3  ;;  %1143 = vmatpush3.bf16.msra.mxu0 %v1428_v3 }
  0x36   :  { %1072 = vmatprep.subr.bf16.mxu1 %v1261_v0  ;;  %1144 = vmatprep.subr.bf16.mxu0 %v1261_v0 }
  0x38   :  { %871 = vmatmul.mubr.f32.vlgmr.msra.gmra.mrb[0].mxu1 %v137_v10  ;;  %976 = vmatmul.mubr.f32.vlgmr.msra.gmra.mrb[0].mxu0 %v135_v53  ;;  %v1151_v53 = vpack.c.bf16 %v181_v2, %v174_v63  ;;  %v217_v63 = vsub.f32 %v1450_v21, %v216_v56  ;;  %v230_v2 = vand.u32 4294901760, %v1466_v30  ;;  %v1085_v10 = vpack.c.bf16 %v211_v5, %v204_v62 }
  0x39   :  { %1074 = vmatpush3.bf16.msra.mxu1 %v1073_v16  ;;  %1146 = vmatpush3.bf16.msra.mxu0 %v1145_v9  ;;  %v244_v9 = vand.u32 4294901760, %v1486_v44  ;;  %v1160_v16 = vpack.c.bf16 %v223_v38, %v216_v56 }
  0x3a   :  { %1075 = vmatprep.subr.bf16.mxu1 %v1261_v0  ;;  %1147 = vmatprep.subr.bf16.mxu0 %v1261_v0  ;;  %v218_v51 = vand.u32 4294901760, %v217_v63  ;;  %v231_v52 = vsub.f32 %v1466_v30, %v230_v2  ;;  %v1163_v27 = vpack.c.bf16 %v237_v45, %v230_v2 }
  0x3b   :  { %905 = vmatprep.mubr.msk.f32.mxu1 %vm1262_vm0, %v1263_v1  ;;  %1010 = vmatprep.mubr.msk.f32.mxu0 %vm1262_vm0, %v1263_v1  ;;  %v1166_v35 = vpack.c.bf16 %v251_v15, %v244_v9 }
  0x3c   :  { %v232_v17 = vand.u32 4294901760, %v231_v52  ;;  %v1088_v18 = vpack.c.bf16 %v225_v11, %v218_v51 }
  0x3d   :  { %1077 = vmatpush3.bf16.msra.mxu1 %v1076_v28  ;;  %1149 = vmatpush3.bf16.msra.mxu0 %v1148_v23  ;;  %v245_v23 = vsub.f32 %v1486_v44, %v244_v9 }
  0x3e   :  { %1078 = vmatprep.subr.bf16.mxu1 %v1261_v0  ;;  %1150 = vmatprep.subr.bf16.mxu0 %v1261_v0  ;;  %v1091_v26 = vpack.c.bf16 %v239_v19, %v232_v17 }
  0x3f   :  { %v246_v28 = vand.u32 4294901760, %v245_v23 }
  0x41   :  { %1080 = vmatpush3.bf16.msra.mxu1 %v1079_v48  ;;  %1152 = vmatpush3.bf16.msra.mxu0 %v1151_v53  ;;  %v1094_v29 = vpack.c.bf16 %v253_v47, %v246_v28  ;;  %v1097_v48 = vpack.c.bf16 %v1354_v33, %v1350_v31  ;;  %v1100_v53 = vpack.c.bf16 %v1370_v40, %v1368_v39  ;;  %v713_v33 = vlaneseq  ;;  %v735_v39 = vld [vmem:[%s1582_s3] ss:$0 sm:$0xff]  ;;  %s1232_s3 = scalar_lea.vmem %s727_s13, 128 }
  0x42   :  { %1081 = vmatprep.subr.bf16.mxu1 %v1261_v0  ;;  %1153 = vmatprep.subr.bf16.mxu0 %v1261_v0  ;;  %v1103_v31 = vpack.c.bf16 %v1395_v50, %v1393_v49  ;;  %p1233_p8 = scmp.ne.s32.totalorder %s727_s13, %s1232_s3  ;;  %p1238_p10 = scmp.lt.s32.totalorder %s1232_s3, %s1232_s3 }
  0x44   :  { %p1239_p11 = por %p1238_p10, %p1237_p9 }
  0x45   :  { %1083 = vmatpush3.bf16.msra.mxu1 %v1082_v4  ;;  %1155 = vmatpush3.bf16.msra.mxu0 %v1154_v61 }
  0x46   :  { %1084 = vmatprep.subr.bf16.mxu1 %v1261_v0  ;;  %1156 = vmatprep.subr.bf16.mxu0 %v1261_v0  ;;  %p1240_p12 = pnand %p1239_p11, %p1233_p8 }
  0x49   :  { %1086 = vmatpush3.bf16.msra.mxu1 %v1085_v10  ;;  %1158 = vmatpush3.bf16.msra.mxu0 %v1157_v46 }
  0x4a   :  { %1087 = vmatprep.subr.bf16.mxu1 %v1261_v0  ;;  %1159 = vmatprep.subr.bf16.mxu0 %v1261_v0 }
  0x4d   :  { %1089 = vmatpush3.bf16.msra.mxu1 %v1088_v18  ;;  %1161 = vmatpush3.bf16.msra.mxu0 %v1160_v16 }
  0x4e   :  { %1090 = vmatprep.subr.bf16.mxu1 %v1261_v0  ;;  %1162 = vmatprep.subr.bf16.mxu0 %v1261_v0 }
  0x51   :  { %1092 = vmatpush3.bf16.msra.mxu1 %v1091_v26  ;;  %1164 = vmatpush3.bf16.msra.mxu0 %v1163_v27 }
  0x52   :  { %1093 = vmatprep.subr.bf16.mxu1 %v1261_v0  ;;  %1165 = vmatprep.subr.bf16.mxu0 %v1261_v0 }
  0x55   :  { %1095 = vmatpush3.bf16.msra.mxu1 %v1094_v29  ;;  %1167 = vmatpush3.bf16.msra.mxu0 %v1166_v35 }
  0x56   :  { %1096 = vmatprep.subr.bf16.mxu1 %v1261_v0  ;;  %1168 = vmatprep.subr.bf16.mxu0 %v1261_v0 }
  0x58   :  { %906 = vmatmul.mubr.f32.vlgmr.msra.gmra.mrb[0].mxu1 %v1352_v32  ;;  %1011 = vmatmul.mubr.f32.vlgmr.msra.gmra.mrb[0].mxu0 %v1352_v32 }
  0x59   :  { %1098 = vmatpush3.bf16.msra.mxu1 %v1097_v48  ;;  %1170 = vmatpush3.bf16.msra.mxu0 %v1314_v13  ;;  %v1106_v13 = vpack.c.bf16 %v1416_v60, %v1414_v59 }
  0x5a   :  { %1099 = vmatprep.subr.bf16.mxu1 %v1261_v0  ;;  %1171 = vmatprep.subr.bf16.mxu0 %v1261_v0 }
  0x5b   :  { %940 = vmatprep.mubr.msk.f32.mxu1 %vm1262_vm0, %v1263_v1  ;;  %1045 = vmatprep.mubr.msk.f32.mxu0 %vm1262_vm0, %v1263_v1  ;;  %v1109_v1 = vpack.c.bf16 %v1437_v8, %v1434_v7 }
  0x5d   :  { %1101 = vmatpush3.bf16.msra.mxu1 %v1100_v53  ;;  %1173 = vmatpush3.bf16.msra.mxu0 %v1318_v14  ;;  %v1112_v14 = vpack.c.bf16 %v1455_v22, %v1450_v21 }
  0x5e   :  { %1102 = vmatprep.subr.bf16.mxu1 %v1261_v0  ;;  %1174 = vmatprep.subr.bf16.mxu0 %v1261_v0 }
  0x61   :  { %1104 = vmatpush3.bf16.msra.mxu1 %v1103_v31  ;;  %1176 = vmatpush3.bf16.msra.mxu0 %v1327_v20  ;;  %v1115_v20 = vpack.c.bf16 %v1471_v36, %v1466_v30 }
  0x62   :  { %1105 = vmatprep.subr.bf16.mxu1 %v1261_v0  ;;  %1177 = vmatprep.subr.bf16.mxu0 %v1261_v0 }
  0x65   :  { %1107 = vmatpush3.bf16.msra.mxu1 %v1106_v13  ;;  %1179 = vmatpush3.bf16.msra.mxu0 %v1337_v25  ;;  %v1118_v25 = vpack.c.bf16 %v1491_v58, %v1486_v44 }
  0x66   :  { %1108 = vmatprep.subr.bf16.mxu1 %v1261_v0  ;;  %1180 = vmatprep.subr.bf16.mxu0 %v1261_v0 }
  0x69   :  { %1110 = vmatpush3.bf16.msra.mxu1 %v1109_v1  ;;  %1182 = vmatpush3.bf16.msra.mxu0 %v1358_v34  ;;  %v714_v34 = vshrl.u32 %v713_v33, 7 }
  0x6a   :  { %1111 = vmatprep.subr.bf16.mxu1 %v1261_v0  ;;  %1183 = vmatprep.subr.bf16.mxu0 %v1261_v0 }
  0x6d   :  { %1113 = vmatpush3.bf16.msra.mxu1 %v1112_v14  ;;  %1185 = vmatpush3.bf16.msra.mxu0 %v1382_v43  ;;  %v695_v43 = vld [vmem:[%s1583_s4] sm:$0x1] }
  0x6e   :  { %1114 = vmatprep.subr.bf16.mxu1 %v1261_v0  ;;  %1186 = vmatprep.subr.bf16.mxu0 %v1261_v0 }
  0x71   :  { %1116 = vmatpush3.bf16.msra.mxu1 %v1115_v20  ;;  %1188 = vmatpush3.bf16.msra.mxu0 %v1407_v55 }
  0x72   :  { %1117 = vmatprep.subr.bf16.mxu1 %v1261_v0  ;;  %1189 = vmatprep.subr.bf16.mxu0 %v1261_v0 }
  0x75   :  { %1119 = vmatpush3.bf16.msra.mxu1 %v1118_v25  ;;  %1191 = vmatpush3.bf16.msra.mxu0 %v1428_v3  ;;  %v715_v3 = vsub.s32 0, %v714_v34 }
  0x78   :  { %941 = vmatmul.mubr.f32.vlgmr.msra.gmra.mrb[0].mxu1 %v1374_v42  ;;  %1046 = vmatmul.mubr.f32.vlgmr.msra.gmra.mrb[0].mxu0 %v1352_v32  ;;  %v711_v42 = vsub.f32 0.0, %v695_v43 }
  0x7a   :  { %v716_v8 = vrot.slane %v711_v42, %v715_v3 }
  0x96   :  { %v699_v40 = vpop.permute.xlu0 %698 }
  0x97   :  { %v707_v60 = vadd.f32 %v735_v39, %v699_v40 }
 0x14b   :  { %v394_v49 = vpop.f32.mrb[0].mxu1  ;;  %v689_v0 = vpop.f32.mrb[0].mxu0 }
 0x14c   :  { %v1192_v50 = vadd.f32 %v689_v0, %v394_v49  ;;  %v942_v55 = vpop.f32.mrb[1].mxu1  ;;  %v1047_v59 = vpop.f32.mrb[1].mxu0 }
 0x14e   :  { %v708_v32 = vmul.f32 2.0, %v1192_v50 }
 0x150   :  { %v709_v7 = vsub.f32 %v707_v60, %v708_v32 }
 0x152   :  { %v710_v21 = vmax.f32 %v709_v7, 0.0 }
 0x154   :  { %v718_v22 = vmul.f32 %v716_v8, %v710_v21 }
 0x156   :  { %719 = vst [vmem:[#allocation5] sm:$0xff] %v718_v22 }
 0x157   :  { %1243 = shalt.err (!%p1240_p12)
}
 0x158   :  { %s1244_s15 = scalar_lea.hbm %s1584_s5, 128 }
 0x159   :  { %p1245_p13 = scmp.ne.s32.totalorder %s1584_s5, %s1244_s15  ;;  %p1248_p0 = scmp.lt.u32.totalorder %s1244_s15, %s1584_s5 }
 0x15b   :  { %p1250_p1 = pnand %p1248_p0, %p1245_p13 }
 0x15d   :  { %1253 = shalt.err (!%p1250_p1)
}
 0x15e   :  { %729 = dma.vmem_to_hbm [thread:$0]  %s727_s13, 128, %s1584_s5, [#allocation4]  }
 0x15f   :  { %1256 = dma.done.wait [#allocation4], 128  }
 0x160   :  { %1257 = vsyncadd [#allocation4], 4294967168 }
 0x161   :  { %733 = vsyncpa [#allocation3], 1 }
 0x162   :  { %734 = vsyncpa [#allocation4], 1 }

</bundles_post_ra>
